<compile_context>
chip_gen: v5e
topology: v5e:2x2
jax: 0.10.0
libtpu: 0.0.40
codegen_flags: <defaults>
</compile_context>

<pallas_src>
import jax
import jax.numpy as jnp
from jax.experimental import pallas as pl
from jax.experimental.pallas import tpu as pltpu


def _round_up(n, m):
    return ((n + m - 1) // m) * m


def _cdiv(a, b):
    return (a + b - 1) // b


# ---------------------------------------------------------------------------
# Kernel
# ---------------------------------------------------------------------------
def vae_kernel(x_ref, eps_ref,
               w1_ref, b1_ref,
               wmv_ref, bmv_ref,
               dw1_ref, db1_ref,
               dw2_ref, db2_ref,
               recon_ref, mv_ref):
    """One batch tile of the fused VAE forward (encoder -> reparam -> decoder).

    4 MXU matmuls (bf16 operands, f32 accumulation); transcendentals on the EUP.
    """
    L = eps_ref.shape[1]

    # --- Encoder ---
    x = x_ref[...].astype(jnp.bfloat16)
    h = jnp.dot(x, w1_ref[...], preferred_element_type=jnp.float32) + b1_ref[...]
    h = jnp.maximum(h, 0.0)                                    # relu (VALU)

    # fused mean|log_var projection onto a lane-dense (128-multiple wide) slab
    mv = jnp.dot(h.astype(jnp.bfloat16), wmv_ref[...],
                 preferred_element_type=jnp.float32) + bmv_ref[...]
    mean = mv[:, :L]
    log_var = mv[:, L:2 * L]

    # --- Reparameterize ---
    std = jnp.exp(0.5 * log_var)                               # EUP
    z = mean + eps_ref[...] * std

    # --- Decoder ---
    dh = jnp.dot(z.astype(jnp.bfloat16), dw1_ref[...],
                 preferred_element_type=jnp.float32) + db1_ref[...]
    dh = jnp.maximum(dh, 0.0)                                  # relu
    logits = jnp.dot(dh.astype(jnp.bfloat16), dw2_ref[...],
                     preferred_element_type=jnp.float32) + db2_ref[...]

    # sigmoid(x) == 0.5 * (tanh(x/2) + 1): exact, single EUP op per element
    recon_ref[...] = 0.5 * (jnp.tanh(0.5 * logits) + 1.0)

    # packed, lane-dense [mean | log_var | zero-pad] output slab
    mv_ref[...] = mv


# ---------------------------------------------------------------------------
# Tiling / VMEM budgeting
# ---------------------------------------------------------------------------
def _vmem_capacity_bytes():
    try:
        return int(pltpu.get_tpu_info().vmem_capacity_bytes)
    except Exception:
        return 64 * 1024 * 1024  # conservative fallback (v7x per-core VMEM)


def _choose_batch_tile(B, vmem_bytes):
    # Generation-aware target tile (v5e/v6e: 128 MiB VMEM -> 512; v7x: 64 MiB -> 256),
    # capped at ~half the batch (sublane-aligned) so the batch grid has >= 2 steps
    # and "parallel" dimension semantics can shard across both TensorCores on v7x.
    target = 512 if vmem_bytes >= (96 << 20) else 256
    half = _round_up(max(_cdiv(B, 2), 1), 8)
    return max(8, min(target, half))


# ---------------------------------------------------------------------------
# Wrapper
# ---------------------------------------------------------------------------
@jax.jit
def vae_forward(x, eps, kp):
    B, D_in = x.shape
    L = eps.shape[1]
    D_pad = kp["enc_w1"].shape[0]
    H = kp["enc_w1"].shape[1]
    MV_pad = kp["enc_wmv"].shape[1]

    vmem_cap = _vmem_capacity_bytes()
    TB = _choose_batch_tile(B, vmem_cap)
    B_pad = _round_up(B, TB)
    grid = (B_pad // TB,)

    # zero-pad batch rows (and D_in lanes) so every tile is full; sliced off below
    x_p = jnp.zeros((B_pad, D_pad), x.dtype).at[:B, :D_in].set(x)
    eps_p = eps if B_pad == B else jnp.zeros((B_pad, L), eps.dtype).at[:B].set(eps)

    def batch_tiled(width):
        return pl.BlockSpec((TB, width), lambda i: (i, 0))

    def resident(arr):
        # constant block index -> stays VMEM-resident across all grid steps
        return pl.BlockSpec(arr.shape, lambda i: (0, 0))

    weights = [kp["enc_w1"], kp["enc_b1"], kp["enc_wmv"], kp["enc_bmv"],
               kp["dec_w1"], kp["dec_b1"], kp["dec_w2"], kp["dec_b2"]]
    weight_bytes = sum(int(w.size) * w.dtype.itemsize for w in weights)

    # VMEM budget: double-buffered streamed tiles + (double-buffered) resident weights.
    est = 2 * TB * (D_pad + L) * 4          # x, eps input tiles (f32)
    est += 2 * TB * (D_pad + MV_pad) * 4    # recon, mv output tiles (f32)
    est += 2 * weight_bytes
    vmem_limit = int(min(max(2 * est, 32 << 20), int(0.75 * vmem_cap)))

    flops = 2 * B_pad * (D_pad * H + H * MV_pad + L * H + H * D_pad)
    transcendentals = B_pad * (L + D_pad)   # exp(0.5*log_var) + tanh (sigmoid)
    bytes_accessed = int(x_p.size * 4 + eps_p.size * 4 + weight_bytes
                         + B_pad * (D_pad + MV_pad) * 4)

    recon_p, mv_p = pl.pallas_call(
        vae_kernel,
        out_shape=(
            jax.ShapeDtypeStruct((B_pad, D_pad), jnp.float32),    # reconstruction
            jax.ShapeDtypeStruct((B_pad, MV_pad), jnp.float32),   # [mean | log_var | pad]
        ),
        grid=grid,
        in_specs=[
            batch_tiled(D_pad),              # x
            batch_tiled(L),                  # eps
            resident(kp["enc_w1"]), resident(kp["enc_b1"]),
            resident(kp["enc_wmv"]), resident(kp["enc_bmv"]),
            resident(kp["dec_w1"]), resident(kp["dec_b1"]),
            resident(kp["dec_w2"]), resident(kp["dec_b2"]),
        ],
        out_specs=(
            batch_tiled(D_pad),
            batch_tiled(MV_pad),
        ),
        compiler_params=pltpu.CompilerParams(
            dimension_semantics=("parallel",),
            vmem_limit_bytes=vmem_limit),
        cost_estimate=pl.CostEstimate(
            flops=flops,
            transcendentals=transcendentals,
            bytes_accessed=bytes_accessed),
    )(x_p, eps_p,
      kp["enc_w1"], kp["enc_b1"],
      kp["enc_wmv"], kp["enc_bmv"],
      kp["dec_w1"], kp["dec_b1"],
      kp["dec_w2"], kp["dec_b2"])

    recon = recon_p[:B, :D_in]
    mean = mv_p[:B, :L]
    log_var = mv_p[:B, L:2 * L]
    return recon, mean, log_var


# ---------------------------------------------------------------------------
# Parameter construction
# ---------------------------------------------------------------------------
def init_params(key, input_dim, hidden_dim, latent_dim):
    """Torch-Linear-like init. Weights stored as [in, out] (transposed vs. torch)."""
    ks = jax.random.split(key, 10)

    def lin(kw, kb, fan_in, fan_out):
        bound = 1.0 / jnp.sqrt(fan_in)
        w = jax.random.uniform(kw, (fan_in, fan_out), jnp.float32, -bound, bound)
        b = jax.random.uniform(kb, (1, fan_out), jnp.float32, -bound, bound)
        return w, b

    p = {}
    p["enc_w1"], p["enc_b1"] = lin(ks[0], ks[1], input_dim, hidden_dim)
    p["enc_wm"], p["enc_bm"] = lin(ks[2], ks[3], hidden_dim, latent_dim)
    p["enc_wv"], p["enc_bv"] = lin(ks[4], ks[5], hidden_dim, latent_dim)
    p["dec_w1"], p["dec_b1"] = lin(ks[6], ks[7], latent_dim, hidden_dim)
    p["dec_w2"], p["dec_b2"] = lin(ks[8], ks[9], hidden_dim, input_dim)
    return p


def prepare_params(p):
    """One-time kernel-ready params: fused mean|log_var projection, zero-padding
    to 128-lane multiples, bf16 weights (biases stay f32 for f32 accumulation)."""
    input_dim, hidden_dim = p["enc_w1"].shape
    latent_dim = p["enc_wm"].shape[1]
    D_pad = _round_up(input_dim, 128)
    MV_pad = _round_up(2 * latent_dim, 128)

    def pad_to(a, shape):
        return jnp.zeros(shape, a.dtype).at[:a.shape[0], :a.shape[1]].set(a)

    wmv = jnp.concatenate([p["enc_wm"], p["enc_wv"]], axis=1)
    bmv = jnp.concatenate([p["enc_bm"], p["enc_bv"]], axis=1)

    return {
        "enc_w1": pad_to(p["enc_w1"], (D_pad, hidden_dim)).astype(jnp.bfloat16),
        "enc_b1": p["enc_b1"],
        "enc_wmv": pad_to(wmv, (hidden_dim, MV_pad)).astype(jnp.bfloat16),
        "enc_bmv": pad_to(bmv, (1, MV_pad)),
        "dec_w1": p["dec_w1"].astype(jnp.bfloat16),
        "dec_b1": p["dec_b1"],
        "dec_w2": pad_to(p["dec_w2"], (hidden_dim, D_pad)).astype(jnp.bfloat16),
        "dec_b2": pad_to(p["dec_b2"], (1, D_pad)),
    }


def vae_reference(x, eps, p):
    """Pure-JAX f32 reference for sanity checking."""
    h = jax.nn.relu(x @ p["enc_w1"] + p["enc_b1"])
    mean = h @ p["enc_wm"] + p["enc_bm"]
    log_var = h @ p["enc_wv"] + p["enc_bv"]
    z = mean + eps * jnp.exp(0.5 * log_var)
    dh = jax.nn.relu(z @ p["dec_w1"] + p["dec_b1"])
    recon = jax.nn.sigmoid(dh @ p["dec_w2"] + p["dec_b2"])
    return recon, mean, log_var


if __name__ == "__main__":
    # Small demo shapes (B=16 -> padded batch grid of 2 steps with TB=8).
    B, INPUT_DIM, HIDDEN_DIM, LATENT_DIM = 16, 128, 64, 32

    key = jax.random.PRNGKey(0)
    k_x, k_eps, k_params = jax.random.split(key, 3)

    x = jax.random.uniform(k_x, (B, INPUT_DIM), jnp.float32)      # "data" in [0,1)
    eps = jax.random.normal(k_eps, (B, LATENT_DIM), jnp.float32)  # reparam noise
    params = init_params(k_params, INPUT_DIM, HIDDEN_DIM, LATENT_DIM)
    kparams = prepare_params(params)                              # one-time fuse/pad/cast

    recon, mean, log_var = vae_forward(x, eps, kparams)
    jax.block_until_ready((recon, mean, log_var))

    # sanity check against a pure-JAX f32 reference.
    # bf16 MXU operands (f32 accumulation) -> modest tolerance vs the f32 reference.
    r_ref, m_ref, lv_ref = vae_reference(x, eps, params)
    assert recon.shape == (B, INPUT_DIM)
    assert mean.shape == (B, LATENT_DIM)
    assert log_var.shape == (B, LATENT_DIM)
    assert jnp.allclose(mean, m_ref, atol=2e-2), "mean mismatch"
    assert jnp.allclose(log_var, lv_ref, atol=2e-2), "log_var mismatch"
    assert jnp.allclose(recon, r_ref, atol=2e-2), "reconstruction mismatch"

    print("KERNEL_OK")
</pallas_src>

<mosaic_0001>
module attributes {stable_mosaic.version = 11 : i64} {
  func.func @vae_kernel(%arg0: i32, %arg1: memref<8x128xf32, #tpu.memory_space<vmem>>, %arg2: memref<8x32xf32, #tpu.memory_space<vmem>>, %arg3: memref<128x64xbf16, #tpu.memory_space<vmem>>, %arg4: memref<1x64xf32, #tpu.memory_space<vmem>>, %arg5: memref<64x128xbf16, #tpu.memory_space<vmem>>, %arg6: memref<1x128xf32, #tpu.memory_space<vmem>>, %arg7: memref<32x64xbf16, #tpu.memory_space<vmem>>, %arg8: memref<1x64xf32, #tpu.memory_space<vmem>>, %arg9: memref<64x128xbf16, #tpu.memory_space<vmem>>, %arg10: memref<1x128xf32, #tpu.memory_space<vmem>>, %arg11: memref<8x128xf32, #tpu.memory_space<vmem>>, %arg12: memref<8x128xf32, #tpu.memory_space<vmem>>) attributes {dimension_semantics = [#tpu.dimension_semantics<parallel>], iteration_bounds = array<i64: 2>, scalar_prefetch = 0 : i64, scratch_operands = 0 : i64, tpu.core_type = #tpu.core_type<tc>, window_params = [{transform_indices = @transform_0, window_bounds = array<i64: 8, 128>}, {transform_indices = @transform_1, window_bounds = array<i64: 8, 32>}, {pipeline_mode = #tpu.pipeline_mode<synchronous>, transform_indices = @transform_2, window_bounds = array<i64: 128, 64>}, {pipeline_mode = #tpu.pipeline_mode<synchronous>, transform_indices = @transform_3, window_bounds = array<i64: 1, 64>}, {pipeline_mode = #tpu.pipeline_mode<synchronous>, transform_indices = @transform_4, window_bounds = array<i64: 64, 128>}, {pipeline_mode = #tpu.pipeline_mode<synchronous>, transform_indices = @transform_5, window_bounds = array<i64: 1, 128>}, {pipeline_mode = #tpu.pipeline_mode<synchronous>, transform_indices = @transform_6, window_bounds = array<i64: 32, 64>}, {pipeline_mode = #tpu.pipeline_mode<synchronous>, transform_indices = @transform_7, window_bounds = array<i64: 1, 64>}, {pipeline_mode = #tpu.pipeline_mode<synchronous>, transform_indices = @transform_8, window_bounds = array<i64: 64, 128>}, {pipeline_mode = #tpu.pipeline_mode<synchronous>, transform_indices = @transform_9, window_bounds = array<i64: 1, 128>}, {transform_indices = @transform_10, window_bounds = array<i64: 8, 128>}, {transform_indices = @transform_11, window_bounds = array<i64: 8, 128>}]} {
    %c0 = arith.constant 0 : index
    %c0_0 = arith.constant 0 : index
    %0 = vector.load %arg1[%c0, %c0_0] : memref<8x128xf32, #tpu.memory_space<vmem>>, vector<8x128xf32>
    %1 = arith.truncf %0 : vector<8x128xf32> to vector<8x128xbf16>
    %c0_1 = arith.constant 0 : index
    %c0_2 = arith.constant 0 : index
    %2 = vector.load %arg3[%c0_1, %c0_2] : memref<128x64xbf16, #tpu.memory_space<vmem>>, vector<128x64xbf16>
    %cst = arith.constant dense<0.000000e+00> : vector<8x64xf32>
    %3 = tpu.matmul %1, %2, %cst {dimension_numbers = #tpu.dot_dimension_numbers<[1], [0], [0], [1], [0, 0, 1, 1], [], []>} : vector<8x128xbf16>, vector<128x64xbf16>, vector<8x64xf32> -> vector<8x64xf32>
    %c0_3 = arith.constant 0 : index
    %c0_4 = arith.constant 0 : index
    %4 = vector.load %arg4[%c0_3, %c0_4] : memref<1x64xf32, #tpu.memory_space<vmem>>, vector<1x64xf32>
    %5 = vector.broadcast %4 : vector<1x64xf32> to vector<8x64xf32>
    %6 = arith.addf %3, %5 : vector<8x64xf32>
    %cst_5 = arith.constant 0.000000e+00 : f32
    %7 = vector.broadcast %cst_5 : f32 to vector<8x64xf32>
    %8 = arith.maximumf %6, %7 : vector<8x64xf32>
    %9 = arith.truncf %8 : vector<8x64xf32> to vector<8x64xbf16>
    %c0_6 = arith.constant 0 : index
    %c0_7 = arith.constant 0 : index
    %10 = vector.load %arg5[%c0_6, %c0_7] : memref<64x128xbf16, #tpu.memory_space<vmem>>, vector<64x128xbf16>
    %cst_8 = arith.constant dense<0.000000e+00> : vector<8x128xf32>
    %11 = tpu.matmul %9, %10, %cst_8 {dimension_numbers = #tpu.dot_dimension_numbers<[1], [0], [0], [1], [0, 0, 1, 1], [], []>} : vector<8x64xbf16>, vector<64x128xbf16>, vector<8x128xf32> -> vector<8x128xf32>
    %c0_9 = arith.constant 0 : index
    %c0_10 = arith.constant 0 : index
    %12 = vector.load %arg6[%c0_9, %c0_10] : memref<1x128xf32, #tpu.memory_space<vmem>>, vector<1x128xf32>
    %13 = vector.broadcast %12 : vector<1x128xf32> to vector<8x128xf32>
    %14 = arith.addf %11, %13 : vector<8x128xf32>
    %15 = vector.extract_strided_slice %14 {offsets = [0, 0], sizes = [8, 32], strides = [1, 1]} : vector<8x128xf32> to vector<8x32xf32>
    %16 = vector.extract_strided_slice %14 {offsets = [0, 32], sizes = [8, 32], strides = [1, 1]} : vector<8x128xf32> to vector<8x32xf32>
    %cst_11 = arith.constant 5.000000e-01 : f32
    %17 = vector.broadcast %cst_11 : f32 to vector<8x32xf32>
    %18 = arith.mulf %17, %16 : vector<8x32xf32>
    %19 = math.exp %18 : vector<8x32xf32>
    %c0_12 = arith.constant 0 : index
    %c0_13 = arith.constant 0 : index
    %20 = vector.load %arg2[%c0_12, %c0_13] : memref<8x32xf32, #tpu.memory_space<vmem>>, vector<8x32xf32>
    %21 = arith.mulf %20, %19 : vector<8x32xf32>
    %22 = arith.addf %15, %21 : vector<8x32xf32>
    %23 = arith.truncf %22 : vector<8x32xf32> to vector<8x32xbf16>
    %c0_14 = arith.constant 0 : index
    %c0_15 = arith.constant 0 : index
    %24 = vector.load %arg7[%c0_14, %c0_15] : memref<32x64xbf16, #tpu.memory_space<vmem>>, vector<32x64xbf16>
    %cst_16 = arith.constant dense<0.000000e+00> : vector<8x64xf32>
    %25 = tpu.matmul %23, %24, %cst_16 {dimension_numbers = #tpu.dot_dimension_numbers<[1], [0], [0], [1], [0, 0, 1, 1], [], []>} : vector<8x32xbf16>, vector<32x64xbf16>, vector<8x64xf32> -> vector<8x64xf32>
    %c0_17 = arith.constant 0 : index
    %c0_18 = arith.constant 0 : index
    %26 = vector.load %arg8[%c0_17, %c0_18] : memref<1x64xf32, #tpu.memory_space<vmem>>, vector<1x64xf32>
    %27 = vector.broadcast %26 : vector<1x64xf32> to vector<8x64xf32>
    %28 = arith.addf %25, %27 : vector<8x64xf32>
    %cst_19 = arith.constant 0.000000e+00 : f32
    %29 = vector.broadcast %cst_19 : f32 to vector<8x64xf32>
    %30 = arith.maximumf %28, %29 : vector<8x64xf32>
    %31 = arith.truncf %30 : vector<8x64xf32> to vector<8x64xbf16>
    %c0_20 = arith.constant 0 : index
    %c0_21 = arith.constant 0 : index
    %32 = vector.load %arg9[%c0_20, %c0_21] : memref<64x128xbf16, #tpu.memory_space<vmem>>, vector<64x128xbf16>
    %cst_22 = arith.constant dense<0.000000e+00> : vector<8x128xf32>
    %33 = tpu.matmul %31, %32, %cst_22 {dimension_numbers = #tpu.dot_dimension_numbers<[1], [0], [0], [1], [0, 0, 1, 1], [], []>} : vector<8x64xbf16>, vector<64x128xbf16>, vector<8x128xf32> -> vector<8x128xf32>
    %c0_23 = arith.constant 0 : index
    %c0_24 = arith.constant 0 : index
    %34 = vector.load %arg10[%c0_23, %c0_24] : memref<1x128xf32, #tpu.memory_space<vmem>>, vector<1x128xf32>
    %35 = vector.broadcast %34 : vector<1x128xf32> to vector<8x128xf32>
    %36 = arith.addf %33, %35 : vector<8x128xf32>
    %cst_25 = arith.constant 5.000000e-01 : f32
    %37 = vector.broadcast %cst_25 : f32 to vector<8x128xf32>
    %38 = arith.mulf %37, %36 : vector<8x128xf32>
    %39 = math.tanh %38 : vector<8x128xf32>
    %cst_26 = arith.constant 1.000000e+00 : f32
    %40 = vector.broadcast %cst_26 : f32 to vector<8x128xf32>
    %41 = arith.addf %39, %40 : vector<8x128xf32>
    %cst_27 = arith.constant 5.000000e-01 : f32
    %42 = vector.broadcast %cst_27 : f32 to vector<8x128xf32>
    %43 = arith.mulf %42, %41 : vector<8x128xf32>
    %c0_28 = arith.constant 0 : index
    %c0_29 = arith.constant 0 : index
    %44 = vector.load %arg11[%c0_28, %c0_29] : memref<8x128xf32, #tpu.memory_space<vmem>>, vector<8x128xf32>
    tpu.vector_store %arg11[%c0_28, %c0_29], %43 {strides = array<i32>} : memref<8x128xf32, #tpu.memory_space<vmem>>, vector<8x128xf32>,
    %c0_30 = arith.constant 0 : index
    %c0_31 = arith.constant 0 : index
    %45 = vector.load %arg12[%c0_30, %c0_31] : memref<8x128xf32, #tpu.memory_space<vmem>>, vector<8x128xf32>
    tpu.vector_store %arg12[%c0_30, %c0_31], %14 {strides = array<i32>} : memref<8x128xf32, #tpu.memory_space<vmem>>, vector<8x128xf32>,
    return
  }
  func.func @transform_0(%arg0: i32) -> (i32, i32) {
    %c0_i32 = arith.constant 0 : i32
    %c0_i32_0 = arith.constant 0 : i32
    return %arg0, %c0_i32 : i32, i32
  }
  func.func @transform_1(%arg0: i32) -> (i32, i32) {
    %c0_i32 = arith.constant 0 : i32
    %c0_i32_0 = arith.constant 0 : i32
    return %arg0, %c0_i32 : i32, i32
  }
  func.func @transform_2(%arg0: i32) -> (i32, i32) {
    %c0_i32 = arith.constant 0 : i32
    %c0_i32_0 = arith.constant 0 : i32
    %c0_i32_1 = arith.constant 0 : i32
    return %c0_i32, %c0_i32_0 : i32, i32
  }
  func.func @transform_3(%arg0: i32) -> (i32, i32) {
    %c0_i32 = arith.constant 0 : i32
    %c0_i32_0 = arith.constant 0 : i32
    %c0_i32_1 = arith.constant 0 : i32
    return %c0_i32, %c0_i32_0 : i32, i32
  }
  func.func @transform_4(%arg0: i32) -> (i32, i32) {
    %c0_i32 = arith.constant 0 : i32
    %c0_i32_0 = arith.constant 0 : i32
    %c0_i32_1 = arith.constant 0 : i32
    return %c0_i32, %c0_i32_0 : i32, i32
  }
  func.func @transform_5(%arg0: i32) -> (i32, i32) {
    %c0_i32 = arith.constant 0 : i32
    %c0_i32_0 = arith.constant 0 : i32
    %c0_i32_1 = arith.constant 0 : i32
    return %c0_i32, %c0_i32_0 : i32, i32
  }
  func.func @transform_6(%arg0: i32) -> (i32, i32) {
    %c0_i32 = arith.constant 0 : i32
    %c0_i32_0 = arith.constant 0 : i32
    %c0_i32_1 = arith.constant 0 : i32
    return %c0_i32, %c0_i32_0 : i32, i32
  }
  func.func @transform_7(%arg0: i32) -> (i32, i32) {
    %c0_i32 = arith.constant 0 : i32
    %c0_i32_0 = arith.constant 0 : i32
    %c0_i32_1 = arith.constant 0 : i32
    return %c0_i32, %c0_i32_0 : i32, i32
  }
  func.func @transform_8(%arg0: i32) -> (i32, i32) {
    %c0_i32 = arith.constant 0 : i32
    %c0_i32_0 = arith.constant 0 : i32
    %c0_i32_1 = arith.constant 0 : i32
    return %c0_i32, %c0_i32_0 : i32, i32
  }
  func.func @transform_9(%arg0: i32) -> (i32, i32) {
    %c0_i32 = arith.constant 0 : i32
    %c0_i32_0 = arith.constant 0 : i32
    %c0_i32_1 = arith.constant 0 : i32
    return %c0_i32, %c0_i32_0 : i32, i32
  }
  func.func @transform_10(%arg0: i32) -> (i32, i32) {
    %c0_i32 = arith.constant 0 : i32
    %c0_i32_0 = arith.constant 0 : i32
    return %arg0, %c0_i32 : i32, i32
  }
  func.func @transform_11(%arg0: i32) -> (i32, i32) {
    %c0_i32 = arith.constant 0 : i32
    %c0_i32_0 = arith.constant 0 : i32
    return %arg0, %c0_i32 : i32, i32
  }
}

</mosaic_0001>

<bundles_post_ra>
// kernel: vae_forward.1
= control target key start
LH: loop header
LB: loop body
LE: loop exit
PB: predicated region body
PF: predicated region fallthrough
CT: control target
= control target key end

     0   :  { %s1462_s0 = inlined_call_operand.vmem [shape: f32[16,128], index: 0, kind: input, shape index: {}]   ;;  %s1463_s1 = inlined_call_operand.vmem [shape: f32[16,32], index: 1, kind: input, shape index: {}]   ;;  %s1464_s2 = inlined_call_operand.vmem [shape: bf16[128,64], index: 2, kind: input, shape index: {}]   ;;  %s1465_s3 = inlined_call_operand.vmem [shape: f32[1,64], index: 3, kind: input, shape index: {}]   ;;  %s1466_s4 = inlined_call_operand.vmem [shape: bf16[64,128], index: 4, kind: input, shape index: {}]   ;;  %s1467_s5 = inlined_call_operand.vmem [shape: f32[1,128], index: 5, kind: input, shape index: {}]   ;;  %s1468_s6 = inlined_call_operand.hbm [shape: bf16[32,64], index: 6, kind: input, shape index: {}]   ;;  %s1469_s7 = inlined_call_operand.hbm [shape: f32[1,64], index: 7, kind: input, shape index: {}]   ;;  %s1470_s8 = inlined_call_operand.vmem [shape: bf16[64,128], index: 8, kind: input, shape index: {}]   ;;  %s1471_s9 = inlined_call_operand.hbm [shape: f32[1,128], index: 9, kind: input, shape index: {}]   ;;  %s1472_s10 = inlined_call_operand.hbm [shape: f32[16,128], index: 10, kind: output, shape index: {0}]   ;;  %s1473_s11 = inlined_call_operand.vmem [shape: f32[16,128], index: 11, kind: output, shape index: {1}]  }
   0x1   :  { %1475 = sst [smem:[#allocation14_spill]] %s1468_s6 }
   0x2   :  { %1476 = sst [smem:[#allocation15_spill]] %s1469_s7 }
   0x3   :  { %17 = vsyncpa [#allocation3], 0 }
   0x4   :  { %18 = vsyncpa [#allocation6], 0 }
   0x5   :  { %19 = vsyncpa [#allocation4], 0 }
   0x6   :  { %21 = vsyncpa [#allocation4 + $0x1], 0  ;;  %s1272_s17 = smov 0   ;;  %s1274_s18 = smov 0  }
   0x7   :  { %s1276_s19 = smov 0   ;;  %s1278_s20 = smov 0  }
   0x8 LB: > { %1477 = sst [smem:[#allocation12_spill]] %s1200_s19  ;;  %s1293_s21 = sadd.s32 4294967295, %s1204_s20   ;;  %s1204_s20 = sphi %s1278_s20, %s1489_s20   ;;  %s1200_s19 = sphi %s1276_s19, %s1486_s19   ;;  %s1196_s18 = sphi %s1274_s18, %s1488_s18   ;;  %s1192_s17 = sphi %s1272_s17, %s1487_s17  }
   0x9   : > { %s852_s22 = sadd.s32 4294967294, %s1204_s20   ;;  %s1297_s23 = sadd.s32 1, %s1204_s20  }
   0xa   : > { %s254_s24 = sadd.s32 1, %s1200_s19  ;;  %s251_s25 = ssub.s32 %s1204_s20, %s1297_s23 }
   0xb   : > { %p264_p0 = scmp.ne.s32.totalorder %s1200_s19, %s1196_s18  ;;  %p252_p1 = scmp.eq.s32.totalorder %s251_s25, 0 }
   0xc   : > { %p265_p2 = scmp.eq.s32.totalorder %s1293_s21, 1  ;;  %p270_p3 = scmp.ne.s32.totalorder %s1196_s18, %s1192_s17 }
   0xd   : > { %p271_p4 = scmp.eq.s32.totalorder %s852_s22, 1  ;;  %p853_p7 = scmp.ge.s32.totalorder %s1204_s20, 1 }
   0xe   : > { %s1308_s26 = scalar_select %p252_p1, %s1200_s19, %s254_s24  }
   0xf   : > { %p1310_p5 = por %p265_p2, %p264_p0  ;;  %p1314_p6 = por %p271_p4, %p270_p3 }
  0x10   : > { %1478 = sst [smem:[#allocation13_spill]] %s1308_s26  ;;  %p304_p8 = scmp.lt.s32.totalorder %s1204_s20, 3 }
  0x11   : > { %p991_p9 = scmp.eq.s32.totalorder %s1293_s21, 0  ;;  %s1482_s7 = sld [smem:[#allocation15_spill]] }
  0x12   : > { %p1321_p10 = pnand %p853_p7, %p304_p8  ;;  %s1206_s14 = smov [#allocation5]  }
  0x13   : > { %s344_s15 = sshll.u32 %s1206_s14, 4  ;;  %s1483_s6 = sld [smem:[#allocation14_spill]]  ;;  %s345_s15 = int_to_ptr.vmem [resolvable:$true] %s344_s15 }
  0x14   : > { %p977_p11 = pneg %p1321_p10  ;;  %s1207_s30 = smov [#allocation2]  }
  0x15   : > { %s329_s12 = sshll.u32 %s1207_s30, 4  ;;  %s1208_s14 = smov 64   ;;  %s330_s12 = int_to_ptr.vmem [resolvable:$true] %s329_s12 }
  0x16   : > { %p1335_p12 = pnand %p991_p9, %p977_p11  ;;  %s1210_s26 = smov [#allocation7]  }
  0x17   : > { %s342_s13 = sshll.u32 %s1482_s7, 4  ;;  %s1209_s7 = smov 4   ;;  %s343_s13 = int_to_ptr.hbm [resolvable:$true] %s342_s13 }
  0x18   : > { %983 = dma.hbm_to_vmem [thread:$0]  (!%p1335_p12), %s343_s13, 16, %s345_s15, [#allocation6]  }
  0x19   : > { %s327_s24 = sshll.u32 %s1483_s6, 4  ;;  %s357_s6 = sshll.u32 %s1471_s9, 4  ;;  %s328_s24 = int_to_ptr.hbm [resolvable:$true] %s327_s24  ;;  %s358_s6 = int_to_ptr.hbm [resolvable:$true] %s357_s6 }
  0x1a   : > { %980 = dma.hbm_to_vmem [thread:$0]  (!%p1335_p12), %s328_s24, 256, %s330_s12, [#allocation3], %s1208_s14, %s1208_s14, %s1209_s7  }
  0x1b   : > { %s359_s19 = sshll.u32 %s1210_s26, 4  ;;  %386 = sbr.rel (%p1321_p10) target bundleno = 747 (0x2eb), region = 60  ;;  %s360_s19 = int_to_ptr.vmem [resolvable:$true] %s359_s19 }
  0x1c   : > { %986 = dma.hbm_to_vmem [thread:$0]  (!%p1335_p12), %s358_s6, 16, %s360_s19, [#allocation6]  }
  0x20   : > { %1179 = dma.done.wait (%p991_p9), [#allocation3], 256  }
  0x21   : > { %1181 = vsyncadd (%p991_p9), [#allocation3], 4294967040 }
  0x22   : > { %1183 = dma.done.wait (%p991_p9), [#allocation6], 32  }
  0x23   : > { %1185 = vsyncadd (%p991_p9), [#allocation6], 4294967264  ;;  %v952_v0 = vld [vmem:[%s1464_s2 + $0x38] sm:$0xff]  ;;  %v951_v1 = vld [vmem:[%s1464_s2 + $0x30] sm:$0xff]  ;;  %p444_p13 = scmp.lt.s32.totalorder %s1293_s21, 1  ;;  %vm578_vm0 = vcmask 523264  }
  0x24   : > { %527 = vmatpush.bf16.msra.mxu0 %v952_v0  ;;  %v956_v2 = vld [vmem:[%s1466_s4 + $0x18] sm:$0xff]  ;;  %v955_v3 = vld [vmem:[%s1466_s4 + $0x10] sm:$0xff]  ;;  %v950_v4 = vld [vmem:[%s1464_s2 + $0x28] sm:$0xff]  ;;  %s1211_s30 = smov 96   ;;  %vm626_vm1 = vcmask 261120   ;;  %s1154_s24 = scalar_lea.hbm %s1472_s10, 16 }
  0x25   : > { %586 = vmatpush.bf16.msra.mxu1 %v956_v2  ;;  %v949_v5 = vld [vmem:[%s1464_s2 + $0x20] sm:$0xff]  ;;  %v948_v6 = vld [vmem:[%s1464_s2 + $0x18] sm:$0xff]  ;;  %s445_s7 = scalar_select %p444_p13, %s1293_s21, 1  ;;  %v947_v7 = vld [vmem:[%s1464_s2 + $0x10] sm:$0xff] }
  0x26   : > { %v946_v8 = vld [vmem:[%s1464_s2 + $0x8] sm:$0xff]  ;;  %v945_v9 = vld [vmem:[%s1464_s2] sm:$0xff]  ;;  %v962_v29 = vld [vmem:[%s1470_s8 + $0x18] sm:$0xff] }
  0x27   : > { %s1384_s19 = sshll.u32 %s445_s7, 3  ;;  %v954_v12 = vld [vmem:[%s1466_s4 + $0x8] sm:$0xff]  ;;  %v953_v13 = vld [vmem:[%s1466_s4] sm:$0xff]  ;;  %688 = vmatpush.bf16.msra.mxu3 %v962_v29  ;;  %v961_v30 = vld [vmem:[%s1470_s8 + $0x10] sm:$0xff] }
  0x28   : > { %528 = vmatpush.bf16.msra.mxu0 %v951_v1  ;;  %s447_s25 = scalar_lea.vmem %s1462_s0, %s1384_s19  ;;  %v1036_v14 = vld [vmem:[%s1465_s3] ss:$0 sm:$0xff]  ;;  %v958_v27 = vld [vmem:[#allocation2 + $0x8] sm:$0xff]  ;;  %s451_s6 = scalar_lea.vmem %s1463_s1, %s1384_s19  ;;  %v1038_v38 = vld [vmem:[#allocation5] ss:$0 sm:$0xff] }
  0x29   : > { %587 = vmatpush.bf16.msra.mxu1 %v955_v3  ;;  %v457_v10 = vld [vmem:[%s447_s25] sm:$0xff]  ;;  %s455_s25 = scalar_lea.vmem %s1473_s11, %s1384_s19  ;;  %636 = vmatpush.bf16.msra.mxu2 %v958_v27  ;;  %v960_v36 = vld [vmem:[%s1470_s8 + $0x8] sm:$0xff]  ;;  %v1039_v44 = vld [vmem:[#allocation7] ss:$0 sm:$0xff]  ;;  %s435_s19 = sand.u32 1, %s1196_s18  }
  0x2a   : > { %v458_v11 = vpack.c.bf16 %v457_v10, %v457_v10  ;;  %v1037_v20 = vld [vmem:[%s1467_s5] ss:$0 sm:$0xff] }
  0x2b   : > { %v957_v28 = vld [vmem:[#allocation2] sm:$0xff]  ;;  %689 = vmatpush.bf16.msra.mxu3 %v961_v30 }
  0x2c   : > { %529 = vmatpush.bf16.msra.mxu0 %v950_v4  ;;  %v598_v31 = vld [vmem:[%s451_s6] sm:$0xff]  ;;  %s704_s6 = scalar_lea.sflag [#allocation4], %s435_s19 }
  0x2d   : > { %588 = vmatpush.bf16.msra.mxu1 %v954_v12  ;;  %637 = vmatpush.bf16.msra.mxu2 %v957_v28  ;;  %v959_v37 = vld [vmem:[%s1470_s8] sm:$0xff] }
  0x2f   : > { %690 = vmatpush.bf16.msra.mxu3 %v960_v36 }
  0x30   : > { %530 = vmatpush.bf16.msra.mxu0 %v949_v5 }
  0x31   : > { %589 = vmatpush.bf16.msra.mxu1 %v953_v13 }
  0x33   : > { %691 = vmatpush.bf16.msra.mxu3 %v959_v37 }
  0x34   : > { %531 = vmatpush.bf16.msra.mxu0 %v948_v6 }
  0x38   : > { %532 = vmatpush.bf16.msra.mxu0 %v947_v7 }
  0x3c   : > { %533 = vmatpush.bf16.msra.mxu0 %v946_v8 }
  0x40   : > { %534 = vmatpush.bf16.msra.mxu0 %v945_v9 }
  0x43   : > { %535 = vmatmul.bf16.vlgmr.msra.gmra.mxu0 %v458_v11 }
  0xc0   : > { %v536_v15 = vpop.f32.mrf.mxu0 }
  0xc1   : > { %v537_v16 = vadd.f32 %v1036_v14, %v536_v15 }
  0xc3   : > { %v540_v17 = vmax.f32 %v537_v16, 0.0 }
  0xc5   : > { %v541_v18 = vpack.c.bf16 %v540_v17, %v540_v17 }
  0xc7   : > { %914 = vmatmul.msk.bf16.vlgmr.msra.gmra.mxu1 %vm578_vm0, %v541_v18 }
  0xc8   : > { %v538_v19 = vpop.f32.mrf.mxu0 }
 0x144   : > { %v591_v21 = vpop.f32.mrf.mxu1 }
 0x145   : > { %v592_v22 = vadd.f32 %v1037_v20, %v591_v21 }
 0x147   : > { %v595_v23 = vmul.f32 0.5, %v592_v22  ;;  %702 = vst [vmem:[%s455_s25] sm:$0xff] %v592_v22  ;;  %s862_s25 = sshll.u32 %s435_s19, 3 }
 0x148   : > { %s437_s22 = scalar_lea.vmem [#allocation8], %s862_s25 }
 0x149   : > { %v596_v24 = vmul.f32 1.442695, %v595_v23  ;;  %s720_s7 = sshll.u32 %s437_s22, 4  ;;  %s721_s7 = int_to_ptr.vmem [resolvable:$true] %s720_s7 }
 0x14b   : > { %1040 = vpow2.f32 %v596_v24 }
 0x14c   : > { %v593_v25 = vpop.f32.mrf.mxu1 }
 0x151   : > { %v1041_v26 = vpop.eup %1040 }
 0x152   : > { %600 = vrot.lane.b32.xlu0 %v1041_v26, %s1211_s30  ;;  %s942_s30 = sshll.u32 %s1293_s21, 3 }
 0x153   : > { %s718_s16 = scalar_lea.hbm %s1472_s10, %s942_s30 }
 0x154   : > { %s722_s26 = sshll.u32 %s718_s16, 4  ;;  %s723_s26 = int_to_ptr.hbm [resolvable:$true] %s722_s26 }
 0x155   : > { %s1148_s29 = sshra.s32 %s723_s26, 4  ;;  %s1149_s29 = int_to_ptr.hbm [resolvable:$true] %s1148_s29 }
 0x156   : > { %s1150_s13 = scalar_lea.hbm %s1149_s29, 8  ;;  %p1155_p3 = scmp.lt.s32.totalorder %s1149_s29, %s1472_s10 }
 0x157   : > { %p1151_p0 = scmp.ne.s32.totalorder %s1149_s29, %s1150_s13  ;;  %p1156_p4 = scmp.lt.s32.totalorder %s1154_s24, %s1150_s13 }
 0x159   : > { %p1152_p1 = pnand %p1151_p0, %p1310_p5  ;;  %p1157_p7 = por %p1156_p4, %p1155_p3 }
 0x15b   : > { %p1153_p2 = pneg %p1152_p1 }
 0x15d   : > { %p1158_p8 = pnand %p1157_p7, %p1153_p2 }
 0x1c4   : > { %v601_v32 = vpop.permute.xlu0 %600 }
 0x1c5   : > { %v603_v33 = vmul.f32 %v601_v32, %v598_v31 }
 0x1c7   : > { %v604_v34 = vadd.f32 %v603_v33, %v592_v22 }
 0x1c9   : > { %v605_v35 = vpack.c.bf16 %v604_v34, %v604_v34 }
 0x1cb   : > { %923 = vmatmul.msk.bf16.vlgmr.msra.gmra.mxu2 %vm626_vm1, %v605_v35 }
 0x24e   : > { %v639_v39 = vpop.f32.mrf.mxu2 }
 0x24f   : > { %v640_v40 = vadd.f32 %v1038_v38, %v639_v39 }
 0x251   : > { %v643_v41 = vmax.f32 %v640_v40, 0.0 }
 0x253   : > { %v644_v42 = vpack.c.bf16 %v643_v41, %v643_v41 }
 0x255   : > { %940 = vmatmul.msk.bf16.vlgmr.msra.gmra.mxu3 %vm578_vm0, %v644_v42 }
 0x256   : > { %v641_v43 = vpop.f32.mrf.mxu2 }
 0x2d8   : > { %v693_v45 = vpop.f32.mrf.mxu3 }
 0x2d9   : > { %v694_v46 = vadd.f32 %v1039_v44, %v693_v45 }
 0x2db   : > { %v697_v47 = vmul.f32 0.5, %v694_v46 }
 0x2dd   : > { %1042 = vtanh.f32 %v697_v47 }
 0x2e0   : > { %v695_v48 = vpop.f32.mrf.mxu3 }
 0x2e3   : > { %v1043_v49 = vpop.eup %1042 }
 0x2e4   : > { %v699_v50 = vadd.f32 1.0, %v1043_v49 }
 0x2e6   : > { %v700_v51 = vmul.f32 0.5, %v699_v50 }
 0x2e8   : > { %701 = vst [vmem:[%s437_s22] sm:$0xff] %v700_v51 }
 0x2e9   : > { %1161 = shalt.err (!%p1158_p8)
}
 0x2ea   : > { %975 = dma.vmem_to_hbm [thread:$0]  (%p1310_p5), %s721_s7, 128, %s723_s26, %s704_s6  }
 0x2eb PF: > { %p997_p9 = scmp.ge.s32.totalorder %s1204_s20, 2  ;;  %s737_s19 = sand.u32 1, %s1192_s17  }
 0x2ec   : > { %s738_s12 = scalar_lea.sflag [#allocation4], %s737_s19 }
 0x2ed   : > { %p988_p10 = pnand %p997_p9, %p1314_p6 }
 0x2ef   : > { %p989_p11 = pneg %p988_p10 }
 0x2f1   : > { %1187 = dma.done.wait (%p989_p11), %s738_s12, 128  }
 0x2f2   : > { %1189 = vsyncadd (%p989_p11), %s738_s12, 4294967168  ;;  %s1485_s14 = sld [smem:[#allocation12_spill]]  ;;  %p24_p12 = scmp.ge.s32.totalorder %s1297_s23, 4  }
 0x2f3   : > { %s1486_s19 = sld [smem:[#allocation13_spill]]  ;;  %s1487_s17 = smov %s1196_s18 }
 0x2f4   : > { %s1489_s20 = smov %s1297_s23  ;;  %26 = sbr.rel (!%p24_p12) target bundleno = 8 (0x8), region = 123 }
 0x2f8   : > { %s1488_s18 = smov %s1485_s14 }
 0x2f9   :  { %751 = vsyncpa [#allocation3], 1 }
 0x2fa   :  { %753 = vsyncpa [#allocation3 + $0x1], 1 }
 0x2fb   :  { %754 = vsyncpa [#allocation6], 1 }
 0x2fc   :  { %755 = vsyncpa [#allocation4], 1 }
 0x2fd   :  { %757 = vsyncpa [#allocation4 + $0x1], 1 }

</bundles_post_ra>
